<compile_context>
chip_gen: v7x
topology: tpu7x:2x2x1
jax: 0.10.0
libtpu: 0.0.40
codegen_flags: <defaults>
</compile_context>

<pallas_src>
import functools

import jax
import jax.numpy as jnp
from jax import lax
from jax.experimental import pallas as pl
from jax.experimental.pallas import tpu as pltpu

NUM_VALS = 64
LANES = 128
MAX_TM = 4096   # rows per grid step for large inputs (2 MiB f32 per block)
CHUNK = 64      # rows per in-kernel strip (8 f32 vregs per live array)


def _cdiv(a, b):
    return -(-a // b)


def _round_up(v, m):
    return _cdiv(v, m) * m


def _sublane_quantum(dtype):
    # native sublane packing: 8 rows for 4-byte, 16 for 2-byte, 32 for 1-byte
    return max(8, 32 // jnp.dtype(dtype).itemsize)


def _fp6_swish_kernel(vals_ref, mids_ref, x_ref, o_ref, *, chunk):
    # vals_ref: (64,) f32 in SMEM, sorted ascending.
    # mids_ref: (63,) f32 in SMEM, bin midpoints (vals[j] + vals[j+1]) / 2.
    # x_ref: (TM, 128) input tile (native dtype), o_ref: (TM, 128) output tile.
    num_chunks = x_ref.shape[0] // chunk

    # Hoisted once per grid step (loop-invariant): 127 SMEM scalar loads.
    vals = [vals_ref[j] for j in range(NUM_VALS)]
    mids = [mids_ref[j] for j in range(NUM_VALS - 1)]

    def process(r0):
        x = x_ref[pl.ds(r0, chunk), :].astype(jnp.float32)
        # SiLU: x * sigmoid(x).  exp and approx reciprocal both go to the EUP
        # slot, leaving the VALU slots to the select chain below.
        s = x * pl.reciprocal(1.0 + jnp.exp(-x), approx=True)
        # Nearest-grid quantization via a single-pass midpoint scan.
        # Equivalent to searchsorted(left) + clamp + nearest (tie -> low).
        # NOTE: NaN inputs map to vals[0] (all compares false), which differs
        # from torch.searchsorted's NaN placement; finite inputs match.
        out = jnp.broadcast_to(vals[0], s.shape)
        for j in range(NUM_VALS - 1):
            out = jnp.where(s > mids[j], vals[j + 1], out)
        o_ref[pl.ds(r0, chunk), :] = out.astype(o_ref.dtype)

    if num_chunks <= 2:
        for c in range(num_chunks):
            process(c * chunk)
    else:
        pairs = num_chunks // 2

        def body(c, carry):
            r0 = pl.multiple_of(c * (2 * chunk), chunk)
            process(r0)
            process(pl.multiple_of(r0 + chunk, chunk))
            return carry

        lax.fori_loop(0, pairs, body, 0)
        if num_chunks % 2:
            process((num_chunks - 1) * chunk)


def _choose_tiles(rows, q):
    if rows >= 2 * MAX_TM:
        return MAX_TM, CHUNK
    if rows <= q:
        return rows, rows        # single tiny block spanning the full array
    # Small/medium inputs: aim for ~2 grid steps (keeps both v7x TensorCores
    # busy) while keeping the block row count sublane-aligned.
    tm = max(q, _round_up(_cdiv(rows, 2), q))
    chunk = min(CHUNK, tm)       # CHUNK (64) is a multiple of every quantum
    tm = _round_up(tm, chunk)
    return tm, chunk


def _fp6_swish_impl(x, fp6_values):
    vals = jnp.sort(fp6_values.astype(jnp.float32))   # torch.sort in forward()
    mids = 0.5 * (vals[:-1] + vals[1:])                # 63 bin midpoints

    orig_shape, orig_dtype = x.shape, x.dtype
    flat = x.reshape(-1)                               # native dtype, no cast pass
    n = flat.shape[0]

    pad = (-n) % LANES                                 # only ragged inputs pay this
    if pad:
        flat = jnp.pad(flat, (0, pad))
    rows = (n + pad) // LANES
    x2 = flat.reshape(rows, LANES)

    q = _sublane_quantum(orig_dtype)
    tm, chunk = _choose_tiles(rows, q)
    grid = _cdiv(rows, tm)                             # partial last block OK

    out = pl.pallas_call(
        functools.partial(_fp6_swish_kernel, chunk=chunk),
        out_shape=jax.ShapeDtypeStruct((rows, LANES), orig_dtype),
        grid_spec=pl.GridSpec(
            grid=(grid,),
            in_specs=[
                pl.BlockSpec(memory_space=pltpu.MemorySpace.SMEM),  # vals
                pl.BlockSpec(memory_space=pltpu.MemorySpace.SMEM),  # midpoints
                pl.BlockSpec((tm, LANES), lambda i: (i, 0)),        # x tile
            ],
            out_specs=pl.BlockSpec((tm, LANES), lambda i: (i, 0)),
        ),
        compiler_params=pltpu.CompilerParams(
            dimension_semantics=("parallel",)),
    )(vals, mids, x2)

    out = out.reshape(-1)
    if pad:
        out = out[:n]
    return out.reshape(orig_shape)


@jax.custom_vjp
def fp6_swish(x, fp6_values):
    """FP6Swish forward: quantize(silu(x)) onto the learnable 64-value grid."""
    return _fp6_swish_impl(x, fp6_values)


def _fp6_swish_fwd(x, fp6_values):
    return _fp6_swish_impl(x, fp6_values), (x, fp6_values)


def _fp6_swish_bwd(res, g):
    # STE through the quantizer (d quant / d s = 1) chain-ruled with silu'(x);
    # no gradient to the value table (torch backward returns None for vals).
    x, fp6_values = res
    xf = x.astype(jnp.float32)
    sig = 1.0 / (1.0 + jnp.exp(-xf))
    dsilu = sig * (1.0 + xf * (1.0 - sig))
    gx = (g.astype(jnp.float32) * dsilu).astype(x.dtype)
    return gx, jnp.zeros_like(fp6_values)


fp6_swish.defvjp(_fp6_swish_fwd, _fp6_swish_bwd)


# ----------------------------- verification -------------------------------- #

def _reference(x, fp6_values):
    # Pure-JAX mirror of torch: silu -> searchsorted(left) -> clamp -> nearest.
    vals = jnp.sort(fp6_values.astype(jnp.float32))
    xf = x.astype(jnp.float32).reshape(-1)
    s = xf * (1.0 / (1.0 + jnp.exp(-xf)))
    idx = jnp.clip(jnp.searchsorted(vals, s, side="left"), 1, NUM_VALS - 1)
    low = vals[idx - 1]
    high = vals[idx]
    q = jnp.where(jnp.abs(s - low) <= jnp.abs(s - high), low, high)
    shp = x.shape
    return s.reshape(shp), q.reshape(shp), low.reshape(shp), high.reshape(shp)


def _check(x, fp6_values):
    y = jax.block_until_ready(fp6_swish(x, fp6_values))
    assert y.shape == x.shape and y.dtype == x.dtype
    s_ref, q_ref, low, high = _reference(x, fp6_values)
    mid = 0.5 * (low + high)
    # Kernel EUP exp / approx-reciprocal and XLA math differ by small relative
    # amounts; within a narrow band around a bin midpoint either neighbor is an
    # acceptable nearest value (band << half the smallest relative bin gap).
    band = 1e-4 + 1e-2 * jnp.abs(mid)
    near_mid = jnp.abs(s_ref - mid) < band
    yf = y.astype(jnp.float32)
    lo_c = low.astype(x.dtype).astype(jnp.float32)
    hi_c = high.astype(x.dtype).astype(jnp.float32)
    q_c = q_ref.astype(x.dtype).astype(jnp.float32)
    ok = jnp.where(near_mid, (yf == lo_c) | (yf == hi_c), yf == q_c)
    assert bool(jnp.all(ok)), "Pallas output mismatch vs reference"


if __name__ == "__main__":
    # Deterministic parameter init exactly as in the module __init__.
    init_vals = [0.0, 0.0625, 0.125, 0.1875, 0.25, 0.3125, 0.375, 0.4375, 0.5,
                 0.625, 0.75, 0.875, 1.0, 1.25, 1.5, 1.75, 2.0, 2.5, 3.0, 3.5,
                 4.0, 5.0, 6.0, 7.0, 8.0, 10.0, 12.0, 14.0, 16.0, 20.0, 24.0,
                 28.0, -0.0625, -0.125, -0.1875, -0.25, -0.3125, -0.375,
                 -0.4375, -0.5, -0.625, -0.75, -0.875, -1.0, -1.25, -1.5,
                 -1.75, -2.0, -2.5, -3.0, -3.5, -4.0, -5.0, -6.0, -7.0, -8.0,
                 -10.0, -12.0, -14.0, -16.0, -20.0, -24.0, -28.0, -32.0]
    fp6_values = jnp.array(sorted(set(init_vals))[:64], dtype=jnp.float32)

    key = jax.random.PRNGKey(0)
    k1, k2, k3, k4 = jax.random.split(key, 4)

    # NCHW conv activations, as implied by the module: tiny 2-step grid.
    _check(jax.random.normal(k1, (2, 4, 16, 16), dtype=jnp.float32) * 4.0,
           fp6_values)
    # Larger input -> exercises the paired fori_loop AND the odd-tail strip.
    _check(jax.random.normal(k2, (6, 8, 32, 32), dtype=jnp.float32) * 4.0,
           fp6_values)
    # Ragged size -> exercises lane padding and the partial boundary block.
    _check(jax.random.normal(k3, (3, 5, 17, 19), dtype=jnp.float32) * 4.0,
           fp6_values)
    # bf16 activations -> native-dtype DMA path with in-tile f32 compute.
    _check((jax.random.normal(k4, (4, 4, 16, 16), dtype=jnp.float32) * 4.0
            ).astype(jnp.bfloat16), fp6_values)

    print("KERNEL_OK")
</pallas_src>

<mosaic_0001>
module attributes {stable_mosaic.version = 11 : i64} {
  func.func @_fp6_swish_kernel(%arg0: i32, %arg1: memref<64xf32, #tpu.memory_space<smem>>, %arg2: memref<63xf32, #tpu.memory_space<smem>>, %arg3: memref<8x128xf32, #tpu.memory_space<vmem>>, %arg4: memref<8x128xf32, #tpu.memory_space<vmem>>) attributes {dimension_semantics = [#tpu.dimension_semantics<parallel>], iteration_bounds = array<i64: 2>, scalar_prefetch = 0 : i64, scratch_operands = 0 : i64, tpu.core_type = #tpu.core_type<tc>, window_params = [{transform_indices = @transform_0, window_bounds = array<i64: 64>}, {transform_indices = @transform_1, window_bounds = array<i64: 63>}, {transform_indices = @transform_2, window_bounds = array<i64: 8, 128>}, {transform_indices = @transform_3, window_bounds = array<i64: 8, 128>}]} {
    %c0 = arith.constant 0 : index
    %0 = memref.load %arg1[%c0] : memref<64xf32, #tpu.memory_space<smem>>
    %c1 = arith.constant 1 : index
    %1 = memref.load %arg1[%c1] : memref<64xf32, #tpu.memory_space<smem>>
    %c2 = arith.constant 2 : index
    %2 = memref.load %arg1[%c2] : memref<64xf32, #tpu.memory_space<smem>>
    %c3 = arith.constant 3 : index
    %3 = memref.load %arg1[%c3] : memref<64xf32, #tpu.memory_space<smem>>
    %c4 = arith.constant 4 : index
    %4 = memref.load %arg1[%c4] : memref<64xf32, #tpu.memory_space<smem>>
    %c5 = arith.constant 5 : index
    %5 = memref.load %arg1[%c5] : memref<64xf32, #tpu.memory_space<smem>>
    %c6 = arith.constant 6 : index
    %6 = memref.load %arg1[%c6] : memref<64xf32, #tpu.memory_space<smem>>
    %c7 = arith.constant 7 : index
    %7 = memref.load %arg1[%c7] : memref<64xf32, #tpu.memory_space<smem>>
    %c8 = arith.constant 8 : index
    %8 = memref.load %arg1[%c8] : memref<64xf32, #tpu.memory_space<smem>>
    %c9 = arith.constant 9 : index
    %9 = memref.load %arg1[%c9] : memref<64xf32, #tpu.memory_space<smem>>
    %c10 = arith.constant 10 : index
    %10 = memref.load %arg1[%c10] : memref<64xf32, #tpu.memory_space<smem>>
    %c11 = arith.constant 11 : index
    %11 = memref.load %arg1[%c11] : memref<64xf32, #tpu.memory_space<smem>>
    %c12 = arith.constant 12 : index
    %12 = memref.load %arg1[%c12] : memref<64xf32, #tpu.memory_space<smem>>
    %c13 = arith.constant 13 : index
    %13 = memref.load %arg1[%c13] : memref<64xf32, #tpu.memory_space<smem>>
    %c14 = arith.constant 14 : index
    %14 = memref.load %arg1[%c14] : memref<64xf32, #tpu.memory_space<smem>>
    %c15 = arith.constant 15 : index
    %15 = memref.load %arg1[%c15] : memref<64xf32, #tpu.memory_space<smem>>
    %c16 = arith.constant 16 : index
    %16 = memref.load %arg1[%c16] : memref<64xf32, #tpu.memory_space<smem>>
    %c17 = arith.constant 17 : index
    %17 = memref.load %arg1[%c17] : memref<64xf32, #tpu.memory_space<smem>>
    %c18 = arith.constant 18 : index
    %18 = memref.load %arg1[%c18] : memref<64xf32, #tpu.memory_space<smem>>
    %c19 = arith.constant 19 : index
    %19 = memref.load %arg1[%c19] : memref<64xf32, #tpu.memory_space<smem>>
    %c20 = arith.constant 20 : index
    %20 = memref.load %arg1[%c20] : memref<64xf32, #tpu.memory_space<smem>>
    %c21 = arith.constant 21 : index
    %21 = memref.load %arg1[%c21] : memref<64xf32, #tpu.memory_space<smem>>
    %c22 = arith.constant 22 : index
    %22 = memref.load %arg1[%c22] : memref<64xf32, #tpu.memory_space<smem>>
    %c23 = arith.constant 23 : index
    %23 = memref.load %arg1[%c23] : memref<64xf32, #tpu.memory_space<smem>>
    %c24 = arith.constant 24 : index
    %24 = memref.load %arg1[%c24] : memref<64xf32, #tpu.memory_space<smem>>
    %c25 = arith.constant 25 : index
    %25 = memref.load %arg1[%c25] : memref<64xf32, #tpu.memory_space<smem>>
    %c26 = arith.constant 26 : index
    %26 = memref.load %arg1[%c26] : memref<64xf32, #tpu.memory_space<smem>>
    %c27 = arith.constant 27 : index
    %27 = memref.load %arg1[%c27] : memref<64xf32, #tpu.memory_space<smem>>
    %c28 = arith.constant 28 : index
    %28 = memref.load %arg1[%c28] : memref<64xf32, #tpu.memory_space<smem>>
    %c29 = arith.constant 29 : index
    %29 = memref.load %arg1[%c29] : memref<64xf32, #tpu.memory_space<smem>>
    %c30 = arith.constant 30 : index
    %30 = memref.load %arg1[%c30] : memref<64xf32, #tpu.memory_space<smem>>
    %c31 = arith.constant 31 : index
    %31 = memref.load %arg1[%c31] : memref<64xf32, #tpu.memory_space<smem>>
    %c32 = arith.constant 32 : index
    %32 = memref.load %arg1[%c32] : memref<64xf32, #tpu.memory_space<smem>>
    %c33 = arith.constant 33 : index
    %33 = memref.load %arg1[%c33] : memref<64xf32, #tpu.memory_space<smem>>
    %c34 = arith.constant 34 : index
    %34 = memref.load %arg1[%c34] : memref<64xf32, #tpu.memory_space<smem>>
    %c35 = arith.constant 35 : index
    %35 = memref.load %arg1[%c35] : memref<64xf32, #tpu.memory_space<smem>>
    %c36 = arith.constant 36 : index
    %36 = memref.load %arg1[%c36] : memref<64xf32, #tpu.memory_space<smem>>
    %c37 = arith.constant 37 : index
    %37 = memref.load %arg1[%c37] : memref<64xf32, #tpu.memory_space<smem>>
    %c38 = arith.constant 38 : index
    %38 = memref.load %arg1[%c38] : memref<64xf32, #tpu.memory_space<smem>>
    %c39 = arith.constant 39 : index
    %39 = memref.load %arg1[%c39] : memref<64xf32, #tpu.memory_space<smem>>
    %c40 = arith.constant 40 : index
    %40 = memref.load %arg1[%c40] : memref<64xf32, #tpu.memory_space<smem>>
    %c41 = arith.constant 41 : index
    %41 = memref.load %arg1[%c41] : memref<64xf32, #tpu.memory_space<smem>>
    %c42 = arith.constant 42 : index
    %42 = memref.load %arg1[%c42] : memref<64xf32, #tpu.memory_space<smem>>
    %c43 = arith.constant 43 : index
    %43 = memref.load %arg1[%c43] : memref<64xf32, #tpu.memory_space<smem>>
    %c44 = arith.constant 44 : index
    %44 = memref.load %arg1[%c44] : memref<64xf32, #tpu.memory_space<smem>>
    %c45 = arith.constant 45 : index
    %45 = memref.load %arg1[%c45] : memref<64xf32, #tpu.memory_space<smem>>
    %c46 = arith.constant 46 : index
    %46 = memref.load %arg1[%c46] : memref<64xf32, #tpu.memory_space<smem>>
    %c47 = arith.constant 47 : index
    %47 = memref.load %arg1[%c47] : memref<64xf32, #tpu.memory_space<smem>>
    %c48 = arith.constant 48 : index
    %48 = memref.load %arg1[%c48] : memref<64xf32, #tpu.memory_space<smem>>
    %c49 = arith.constant 49 : index
    %49 = memref.load %arg1[%c49] : memref<64xf32, #tpu.memory_space<smem>>
    %c50 = arith.constant 50 : index
    %50 = memref.load %arg1[%c50] : memref<64xf32, #tpu.memory_space<smem>>
    %c51 = arith.constant 51 : index
    %51 = memref.load %arg1[%c51] : memref<64xf32, #tpu.memory_space<smem>>
    %c52 = arith.constant 52 : index
    %52 = memref.load %arg1[%c52] : memref<64xf32, #tpu.memory_space<smem>>
    %c53 = arith.constant 53 : index
    %53 = memref.load %arg1[%c53] : memref<64xf32, #tpu.memory_space<smem>>
    %c54 = arith.constant 54 : index
    %54 = memref.load %arg1[%c54] : memref<64xf32, #tpu.memory_space<smem>>
    %c55 = arith.constant 55 : index
    %55 = memref.load %arg1[%c55] : memref<64xf32, #tpu.memory_space<smem>>
    %c56 = arith.constant 56 : index
    %56 = memref.load %arg1[%c56] : memref<64xf32, #tpu.memory_space<smem>>
    %c57 = arith.constant 57 : index
    %57 = memref.load %arg1[%c57] : memref<64xf32, #tpu.memory_space<smem>>
    %c58 = arith.constant 58 : index
    %58 = memref.load %arg1[%c58] : memref<64xf32, #tpu.memory_space<smem>>
    %c59 = arith.constant 59 : index
    %59 = memref.load %arg1[%c59] : memref<64xf32, #tpu.memory_space<smem>>
    %c60 = arith.constant 60 : index
    %60 = memref.load %arg1[%c60] : memref<64xf32, #tpu.memory_space<smem>>
    %c61 = arith.constant 61 : index
    %61 = memref.load %arg1[%c61] : memref<64xf32, #tpu.memory_space<smem>>
    %c62 = arith.constant 62 : index
    %62 = memref.load %arg1[%c62] : memref<64xf32, #tpu.memory_space<smem>>
    %c63 = arith.constant 63 : index
    %63 = memref.load %arg1[%c63] : memref<64xf32, #tpu.memory_space<smem>>
    %c0_0 = arith.constant 0 : index
    %64 = memref.load %arg2[%c0_0] : memref<63xf32, #tpu.memory_space<smem>>
    %c1_1 = arith.constant 1 : index
    %65 = memref.load %arg2[%c1_1] : memref<63xf32, #tpu.memory_space<smem>>
    %c2_2 = arith.constant 2 : index
    %66 = memref.load %arg2[%c2_2] : memref<63xf32, #tpu.memory_space<smem>>
    %c3_3 = arith.constant 3 : index
    %67 = memref.load %arg2[%c3_3] : memref<63xf32, #tpu.memory_space<smem>>
    %c4_4 = arith.constant 4 : index
    %68 = memref.load %arg2[%c4_4] : memref<63xf32, #tpu.memory_space<smem>>
    %c5_5 = arith.constant 5 : index
    %69 = memref.load %arg2[%c5_5] : memref<63xf32, #tpu.memory_space<smem>>
    %c6_6 = arith.constant 6 : index
    %70 = memref.load %arg2[%c6_6] : memref<63xf32, #tpu.memory_space<smem>>
    %c7_7 = arith.constant 7 : index
    %71 = memref.load %arg2[%c7_7] : memref<63xf32, #tpu.memory_space<smem>>
    %c8_8 = arith.constant 8 : index
    %72 = memref.load %arg2[%c8_8] : memref<63xf32, #tpu.memory_space<smem>>
    %c9_9 = arith.constant 9 : index
    %73 = memref.load %arg2[%c9_9] : memref<63xf32, #tpu.memory_space<smem>>
    %c10_10 = arith.constant 10 : index
    %74 = memref.load %arg2[%c10_10] : memref<63xf32, #tpu.memory_space<smem>>
    %c11_11 = arith.constant 11 : index
    %75 = memref.load %arg2[%c11_11] : memref<63xf32, #tpu.memory_space<smem>>
    %c12_12 = arith.constant 12 : index
    %76 = memref.load %arg2[%c12_12] : memref<63xf32, #tpu.memory_space<smem>>
    %c13_13 = arith.constant 13 : index
    %77 = memref.load %arg2[%c13_13] : memref<63xf32, #tpu.memory_space<smem>>
    %c14_14 = arith.constant 14 : index
    %78 = memref.load %arg2[%c14_14] : memref<63xf32, #tpu.memory_space<smem>>
    %c15_15 = arith.constant 15 : index
    %79 = memref.load %arg2[%c15_15] : memref<63xf32, #tpu.memory_space<smem>>
    %c16_16 = arith.constant 16 : index
    %80 = memref.load %arg2[%c16_16] : memref<63xf32, #tpu.memory_space<smem>>
    %c17_17 = arith.constant 17 : index
    %81 = memref.load %arg2[%c17_17] : memref<63xf32, #tpu.memory_space<smem>>
    %c18_18 = arith.constant 18 : index
    %82 = memref.load %arg2[%c18_18] : memref<63xf32, #tpu.memory_space<smem>>
    %c19_19 = arith.constant 19 : index
    %83 = memref.load %arg2[%c19_19] : memref<63xf32, #tpu.memory_space<smem>>
    %c20_20 = arith.constant 20 : index
    %84 = memref.load %arg2[%c20_20] : memref<63xf32, #tpu.memory_space<smem>>
    %c21_21 = arith.constant 21 : index
    %85 = memref.load %arg2[%c21_21] : memref<63xf32, #tpu.memory_space<smem>>
    %c22_22 = arith.constant 22 : index
    %86 = memref.load %arg2[%c22_22] : memref<63xf32, #tpu.memory_space<smem>>
    %c23_23 = arith.constant 23 : index
    %87 = memref.load %arg2[%c23_23] : memref<63xf32, #tpu.memory_space<smem>>
    %c24_24 = arith.constant 24 : index
    %88 = memref.load %arg2[%c24_24] : memref<63xf32, #tpu.memory_space<smem>>
    %c25_25 = arith.constant 25 : index
    %89 = memref.load %arg2[%c25_25] : memref<63xf32, #tpu.memory_space<smem>>
    %c26_26 = arith.constant 26 : index
    %90 = memref.load %arg2[%c26_26] : memref<63xf32, #tpu.memory_space<smem>>
    %c27_27 = arith.constant 27 : index
    %91 = memref.load %arg2[%c27_27] : memref<63xf32, #tpu.memory_space<smem>>
    %c28_28 = arith.constant 28 : index
    %92 = memref.load %arg2[%c28_28] : memref<63xf32, #tpu.memory_space<smem>>
    %c29_29 = arith.constant 29 : index
    %93 = memref.load %arg2[%c29_29] : memref<63xf32, #tpu.memory_space<smem>>
    %c30_30 = arith.constant 30 : index
    %94 = memref.load %arg2[%c30_30] : memref<63xf32, #tpu.memory_space<smem>>
    %c31_31 = arith.constant 31 : index
    %95 = memref.load %arg2[%c31_31] : memref<63xf32, #tpu.memory_space<smem>>
    %c32_32 = arith.constant 32 : index
    %96 = memref.load %arg2[%c32_32] : memref<63xf32, #tpu.memory_space<smem>>
    %c33_33 = arith.constant 33 : index
    %97 = memref.load %arg2[%c33_33] : memref<63xf32, #tpu.memory_space<smem>>
    %c34_34 = arith.constant 34 : index
    %98 = memref.load %arg2[%c34_34] : memref<63xf32, #tpu.memory_space<smem>>
    %c35_35 = arith.constant 35 : index
    %99 = memref.load %arg2[%c35_35] : memref<63xf32, #tpu.memory_space<smem>>
    %c36_36 = arith.constant 36 : index
    %100 = memref.load %arg2[%c36_36] : memref<63xf32, #tpu.memory_space<smem>>
    %c37_37 = arith.constant 37 : index
    %101 = memref.load %arg2[%c37_37] : memref<63xf32, #tpu.memory_space<smem>>
    %c38_38 = arith.constant 38 : index
    %102 = memref.load %arg2[%c38_38] : memref<63xf32, #tpu.memory_space<smem>>
    %c39_39 = arith.constant 39 : index
    %103 = memref.load %arg2[%c39_39] : memref<63xf32, #tpu.memory_space<smem>>
    %c40_40 = arith.constant 40 : index
    %104 = memref.load %arg2[%c40_40] : memref<63xf32, #tpu.memory_space<smem>>
    %c41_41 = arith.constant 41 : index
    %105 = memref.load %arg2[%c41_41] : memref<63xf32, #tpu.memory_space<smem>>
    %c42_42 = arith.constant 42 : index
    %106 = memref.load %arg2[%c42_42] : memref<63xf32, #tpu.memory_space<smem>>
    %c43_43 = arith.constant 43 : index
    %107 = memref.load %arg2[%c43_43] : memref<63xf32, #tpu.memory_space<smem>>
    %c44_44 = arith.constant 44 : index
    %108 = memref.load %arg2[%c44_44] : memref<63xf32, #tpu.memory_space<smem>>
    %c45_45 = arith.constant 45 : index
    %109 = memref.load %arg2[%c45_45] : memref<63xf32, #tpu.memory_space<smem>>
    %c46_46 = arith.constant 46 : index
    %110 = memref.load %arg2[%c46_46] : memref<63xf32, #tpu.memory_space<smem>>
    %c47_47 = arith.constant 47 : index
    %111 = memref.load %arg2[%c47_47] : memref<63xf32, #tpu.memory_space<smem>>
    %c48_48 = arith.constant 48 : index
    %112 = memref.load %arg2[%c48_48] : memref<63xf32, #tpu.memory_space<smem>>
    %c49_49 = arith.constant 49 : index
    %113 = memref.load %arg2[%c49_49] : memref<63xf32, #tpu.memory_space<smem>>
    %c50_50 = arith.constant 50 : index
    %114 = memref.load %arg2[%c50_50] : memref<63xf32, #tpu.memory_space<smem>>
    %c51_51 = arith.constant 51 : index
    %115 = memref.load %arg2[%c51_51] : memref<63xf32, #tpu.memory_space<smem>>
    %c52_52 = arith.constant 52 : index
    %116 = memref.load %arg2[%c52_52] : memref<63xf32, #tpu.memory_space<smem>>
    %c53_53 = arith.constant 53 : index
    %117 = memref.load %arg2[%c53_53] : memref<63xf32, #tpu.memory_space<smem>>
    %c54_54 = arith.constant 54 : index
    %118 = memref.load %arg2[%c54_54] : memref<63xf32, #tpu.memory_space<smem>>
    %c55_55 = arith.constant 55 : index
    %119 = memref.load %arg2[%c55_55] : memref<63xf32, #tpu.memory_space<smem>>
    %c56_56 = arith.constant 56 : index
    %120 = memref.load %arg2[%c56_56] : memref<63xf32, #tpu.memory_space<smem>>
    %c57_57 = arith.constant 57 : index
    %121 = memref.load %arg2[%c57_57] : memref<63xf32, #tpu.memory_space<smem>>
    %c58_58 = arith.constant 58 : index
    %122 = memref.load %arg2[%c58_58] : memref<63xf32, #tpu.memory_space<smem>>
    %c59_59 = arith.constant 59 : index
    %123 = memref.load %arg2[%c59_59] : memref<63xf32, #tpu.memory_space<smem>>
    %c60_60 = arith.constant 60 : index
    %124 = memref.load %arg2[%c60_60] : memref<63xf32, #tpu.memory_space<smem>>
    %c61_61 = arith.constant 61 : index
    %125 = memref.load %arg2[%c61_61] : memref<63xf32, #tpu.memory_space<smem>>
    %c62_62 = arith.constant 62 : index
    %126 = memref.load %arg2[%c62_62] : memref<63xf32, #tpu.memory_space<smem>>
    %c0_63 = arith.constant 0 : index
    %c0_64 = arith.constant 0 : index
    %127 = vector.load %arg3[%c0_63, %c0_64] : memref<8x128xf32, #tpu.memory_space<vmem>>, vector<8x128xf32>
    %cst = arith.constant 0.000000e+00 : f32
    %128 = vector.broadcast %cst : f32 to vector<8x128xf32>
    %129 = arith.subf %128, %127 : vector<8x128xf32>
    %130 = math.exp %129 : vector<8x128xf32>
    %cst_65 = arith.constant 1.000000e+00 : f32
    %131 = vector.broadcast %cst_65 : f32 to vector<8x128xf32>
    %132 = arith.addf %131, %130 : vector<8x128xf32>
    %133 = tpu.reciprocal %132 {approx = true} : vector<8x128xf32> -> vector<8x128xf32>
    %134 = arith.mulf %127, %133 : vector<8x128xf32>
    %135 = vector.broadcast %0 : f32 to vector<8x128xf32>
    %136 = vector.broadcast %64 : f32 to vector<8x128xf32>
    %137 = arith.cmpf ogt, %134, %136 : vector<8x128xf32>
    %138 = vector.broadcast %1 : f32 to vector<8x128xf32>
    %139 = arith.select %137, %138, %135 : vector<8x128xi1>, vector<8x128xf32>
    %140 = vector.broadcast %65 : f32 to vector<8x128xf32>
    %141 = arith.cmpf ogt, %134, %140 : vector<8x128xf32>
    %142 = vector.broadcast %2 : f32 to vector<8x128xf32>
    %143 = arith.select %141, %142, %139 : vector<8x128xi1>, vector<8x128xf32>
    %144 = vector.broadcast %66 : f32 to vector<8x128xf32>
    %145 = arith.cmpf ogt, %134, %144 : vector<8x128xf32>
    %146 = vector.broadcast %3 : f32 to vector<8x128xf32>
    %147 = arith.select %145, %146, %143 : vector<8x128xi1>, vector<8x128xf32>
    %148 = vector.broadcast %67 : f32 to vector<8x128xf32>
    %149 = arith.cmpf ogt, %134, %148 : vector<8x128xf32>
    %150 = vector.broadcast %4 : f32 to vector<8x128xf32>
    %151 = arith.select %149, %150, %147 : vector<8x128xi1>, vector<8x128xf32>
    %152 = vector.broadcast %68 : f32 to vector<8x128xf32>
    %153 = arith.cmpf ogt, %134, %152 : vector<8x128xf32>
    %154 = vector.broadcast %5 : f32 to vector<8x128xf32>
    %155 = arith.select %153, %154, %151 : vector<8x128xi1>, vector<8x128xf32>
    %156 = vector.broadcast %69 : f32 to vector<8x128xf32>
    %157 = arith.cmpf ogt, %134, %156 : vector<8x128xf32>
    %158 = vector.broadcast %6 : f32 to vector<8x128xf32>
    %159 = arith.select %157, %158, %155 : vector<8x128xi1>, vector<8x128xf32>
    %160 = vector.broadcast %70 : f32 to vector<8x128xf32>
    %161 = arith.cmpf ogt, %134, %160 : vector<8x128xf32>
    %162 = vector.broadcast %7 : f32 to vector<8x128xf32>
    %163 = arith.select %161, %162, %159 : vector<8x128xi1>, vector<8x128xf32>
    %164 = vector.broadcast %71 : f32 to vector<8x128xf32>
    %165 = arith.cmpf ogt, %134, %164 : vector<8x128xf32>
    %166 = vector.broadcast %8 : f32 to vector<8x128xf32>
    %167 = arith.select %165, %166, %163 : vector<8x128xi1>, vector<8x128xf32>
    %168 = vector.broadcast %72 : f32 to vector<8x128xf32>
    %169 = arith.cmpf ogt, %134, %168 : vector<8x128xf32>
    %170 = vector.broadcast %9 : f32 to vector<8x128xf32>
    %171 = arith.select %169, %170, %167 : vector<8x128xi1>, vector<8x128xf32>
    %172 = vector.broadcast %73 : f32 to vector<8x128xf32>
    %173 = arith.cmpf ogt, %134, %172 : vector<8x128xf32>
    %174 = vector.broadcast %10 : f32 to vector<8x128xf32>
    %175 = arith.select %173, %174, %171 : vector<8x128xi1>, vector<8x128xf32>
    %176 = vector.broadcast %74 : f32 to vector<8x128xf32>
    %177 = arith.cmpf ogt, %134, %176 : vector<8x128xf32>
    %178 = vector.broadcast %11 : f32 to vector<8x128xf32>
    %179 = arith.select %177, %178, %175 : vector<8x128xi1>, vector<8x128xf32>
    %180 = vector.broadcast %75 : f32 to vector<8x128xf32>
    %181 = arith.cmpf ogt, %134, %180 : vector<8x128xf32>
    %182 = vector.broadcast %12 : f32 to vector<8x128xf32>
    %183 = arith.select %181, %182, %179 : vector<8x128xi1>, vector<8x128xf32>
    %184 = vector.broadcast %76 : f32 to vector<8x128xf32>
    %185 = arith.cmpf ogt, %134, %184 : vector<8x128xf32>
    %186 = vector.broadcast %13 : f32 to vector<8x128xf32>
    %187 = arith.select %185, %186, %183 : vector<8x128xi1>, vector<8x128xf32>
    %188 = vector.broadcast %77 : f32 to vector<8x128xf32>
    %189 = arith.cmpf ogt, %134, %188 : vector<8x128xf32>
    %190 = vector.broadcast %14 : f32 to vector<8x128xf32>
    %191 = arith.select %189, %190, %187 : vector<8x128xi1>, vector<8x128xf32>
    %192 = vector.broadcast %78 : f32 to vector<8x128xf32>
    %193 = arith.cmpf ogt, %134, %192 : vector<8x128xf32>
    %194 = vector.broadcast %15 : f32 to vector<8x128xf32>
    %195 = arith.select %193, %194, %191 : vector<8x128xi1>, vector<8x128xf32>
    %196 = vector.broadcast %79 : f32 to vector<8x128xf32>
    %197 = arith.cmpf ogt, %134, %196 : vector<8x128xf32>
    %198 = vector.broadcast %16 : f32 to vector<8x128xf32>
    %199 = arith.select %197, %198, %195 : vector<8x128xi1>, vector<8x128xf32>
    %200 = vector.broadcast %80 : f32 to vector<8x128xf32>
    %201 = arith.cmpf ogt, %134, %200 : vector<8x128xf32>
    %202 = vector.broadcast %17 : f32 to vector<8x128xf32>
    %203 = arith.select %201, %202, %199 : vector<8x128xi1>, vector<8x128xf32>
    %204 = vector.broadcast %81 : f32 to vector<8x128xf32>
    %205 = arith.cmpf ogt, %134, %204 : vector<8x128xf32>
    %206 = vector.broadcast %18 : f32 to vector<8x128xf32>
    %207 = arith.select %205, %206, %203 : vector<8x128xi1>, vector<8x128xf32>
    %208 = vector.broadcast %82 : f32 to vector<8x128xf32>
    %209 = arith.cmpf ogt, %134, %208 : vector<8x128xf32>
    %210 = vector.broadcast %19 : f32 to vector<8x128xf32>
    %211 = arith.select %209, %210, %207 : vector<8x128xi1>, vector<8x128xf32>
    %212 = vector.broadcast %83 : f32 to vector<8x128xf32>
    %213 = arith.cmpf ogt, %134, %212 : vector<8x128xf32>
    %214 = vector.broadcast %20 : f32 to vector<8x128xf32>
    %215 = arith.select %213, %214, %211 : vector<8x128xi1>, vector<8x128xf32>
    %216 = vector.broadcast %84 : f32 to vector<8x128xf32>
    %217 = arith.cmpf ogt, %134, %216 : vector<8x128xf32>
    %218 = vector.broadcast %21 : f32 to vector<8x128xf32>
    %219 = arith.select %217, %218, %215 : vector<8x128xi1>, vector<8x128xf32>
    %220 = vector.broadcast %85 : f32 to vector<8x128xf32>
    %221 = arith.cmpf ogt, %134, %220 : vector<8x128xf32>
    %222 = vector.broadcast %22 : f32 to vector<8x128xf32>
    %223 = arith.select %221, %222, %219 : vector<8x128xi1>, vector<8x128xf32>
    %224 = vector.broadcast %86 : f32 to vector<8x128xf32>
    %225 = arith.cmpf ogt, %134, %224 : vector<8x128xf32>
    %226 = vector.broadcast %23 : f32 to vector<8x128xf32>
    %227 = arith.select %225, %226, %223 : vector<8x128xi1>, vector<8x128xf32>
    %228 = vector.broadcast %87 : f32 to vector<8x128xf32>
    %229 = arith.cmpf ogt, %134, %228 : vector<8x128xf32>
    %230 = vector.broadcast %24 : f32 to vector<8x128xf32>
    %231 = arith.select %229, %230, %227 : vector<8x128xi1>, vector<8x128xf32>
    %232 = vector.broadcast %88 : f32 to vector<8x128xf32>
    %233 = arith.cmpf ogt, %134, %232 : vector<8x128xf32>
    %234 = vector.broadcast %25 : f32 to vector<8x128xf32>
    %235 = arith.select %233, %234, %231 : vector<8x128xi1>, vector<8x128xf32>
    %236 = vector.broadcast %89 : f32 to vector<8x128xf32>
    %237 = arith.cmpf ogt, %134, %236 : vector<8x128xf32>
    %238 = vector.broadcast %26 : f32 to vector<8x128xf32>
    %239 = arith.select %237, %238, %235 : vector<8x128xi1>, vector<8x128xf32>
    %240 = vector.broadcast %90 : f32 to vector<8x128xf32>
    %241 = arith.cmpf ogt, %134, %240 : vector<8x128xf32>
    %242 = vector.broadcast %27 : f32 to vector<8x128xf32>
    %243 = arith.select %241, %242, %239 : vector<8x128xi1>, vector<8x128xf32>
    %244 = vector.broadcast %91 : f32 to vector<8x128xf32>
    %245 = arith.cmpf ogt, %134, %244 : vector<8x128xf32>
    %246 = vector.broadcast %28 : f32 to vector<8x128xf32>
    %247 = arith.select %245, %246, %243 : vector<8x128xi1>, vector<8x128xf32>
    %248 = vector.broadcast %92 : f32 to vector<8x128xf32>
    %249 = arith.cmpf ogt, %134, %248 : vector<8x128xf32>
    %250 = vector.broadcast %29 : f32 to vector<8x128xf32>
    %251 = arith.select %249, %250, %247 : vector<8x128xi1>, vector<8x128xf32>
    %252 = vector.broadcast %93 : f32 to vector<8x128xf32>
    %253 = arith.cmpf ogt, %134, %252 : vector<8x128xf32>
    %254 = vector.broadcast %30 : f32 to vector<8x128xf32>
    %255 = arith.select %253, %254, %251 : vector<8x128xi1>, vector<8x128xf32>
    %256 = vector.broadcast %94 : f32 to vector<8x128xf32>
    %257 = arith.cmpf ogt, %134, %256 : vector<8x128xf32>
    %258 = vector.broadcast %31 : f32 to vector<8x128xf32>
    %259 = arith.select %257, %258, %255 : vector<8x128xi1>, vector<8x128xf32>
    %260 = vector.broadcast %95 : f32 to vector<8x128xf32>
    %261 = arith.cmpf ogt, %134, %260 : vector<8x128xf32>
    %262 = vector.broadcast %32 : f32 to vector<8x128xf32>
    %263 = arith.select %261, %262, %259 : vector<8x128xi1>, vector<8x128xf32>
    %264 = vector.broadcast %96 : f32 to vector<8x128xf32>
    %265 = arith.cmpf ogt, %134, %264 : vector<8x128xf32>
    %266 = vector.broadcast %33 : f32 to vector<8x128xf32>
    %267 = arith.select %265, %266, %263 : vector<8x128xi1>, vector<8x128xf32>
    %268 = vector.broadcast %97 : f32 to vector<8x128xf32>
    %269 = arith.cmpf ogt, %134, %268 : vector<8x128xf32>
    %270 = vector.broadcast %34 : f32 to vector<8x128xf32>
    %271 = arith.select %269, %270, %267 : vector<8x128xi1>, vector<8x128xf32>
    %272 = vector.broadcast %98 : f32 to vector<8x128xf32>
    %273 = arith.cmpf ogt, %134, %272 : vector<8x128xf32>
    %274 = vector.broadcast %35 : f32 to vector<8x128xf32>
    %275 = arith.select %273, %274, %271 : vector<8x128xi1>, vector<8x128xf32>
    %276 = vector.broadcast %99 : f32 to vector<8x128xf32>
    %277 = arith.cmpf ogt, %134, %276 : vector<8x128xf32>
    %278 = vector.broadcast %36 : f32 to vector<8x128xf32>
    %279 = arith.select %277, %278, %275 : vector<8x128xi1>, vector<8x128xf32>
    %280 = vector.broadcast %100 : f32 to vector<8x128xf32>
    %281 = arith.cmpf ogt, %134, %280 : vector<8x128xf32>
    %282 = vector.broadcast %37 : f32 to vector<8x128xf32>
    %283 = arith.select %281, %282, %279 : vector<8x128xi1>, vector<8x128xf32>
    %284 = vector.broadcast %101 : f32 to vector<8x128xf32>
    %285 = arith.cmpf ogt, %134, %284 : vector<8x128xf32>
    %286 = vector.broadcast %38 : f32 to vector<8x128xf32>
    %287 = arith.select %285, %286, %283 : vector<8x128xi1>, vector<8x128xf32>
    %288 = vector.broadcast %102 : f32 to vector<8x128xf32>
    %289 = arith.cmpf ogt, %134, %288 : vector<8x128xf32>
    %290 = vector.broadcast %39 : f32 to vector<8x128xf32>
    %291 = arith.select %289, %290, %287 : vector<8x128xi1>, vector<8x128xf32>
    %292 = vector.broadcast %103 : f32 to vector<8x128xf32>
    %293 = arith.cmpf ogt, %134, %292 : vector<8x128xf32>
    %294 = vector.broadcast %40 : f32 to vector<8x128xf32>
    %295 = arith.select %293, %294, %291 : vector<8x128xi1>, vector<8x128xf32>
    %296 = vector.broadcast %104 : f32 to vector<8x128xf32>
    %297 = arith.cmpf ogt, %134, %296 : vector<8x128xf32>
    %298 = vector.broadcast %41 : f32 to vector<8x128xf32>
    %299 = arith.select %297, %298, %295 : vector<8x128xi1>, vector<8x128xf32>
    %300 = vector.broadcast %105 : f32 to vector<8x128xf32>
    %301 = arith.cmpf ogt, %134, %300 : vector<8x128xf32>
    %302 = vector.broadcast %42 : f32 to vector<8x128xf32>
    %303 = arith.select %301, %302, %299 : vector<8x128xi1>, vector<8x128xf32>
    %304 = vector.broadcast %106 : f32 to vector<8x128xf32>
    %305 = arith.cmpf ogt, %134, %304 : vector<8x128xf32>
    %306 = vector.broadcast %43 : f32 to vector<8x128xf32>
    %307 = arith.select %305, %306, %303 : vector<8x128xi1>, vector<8x128xf32>
    %308 = vector.broadcast %107 : f32 to vector<8x128xf32>
    %309 = arith.cmpf ogt, %134, %308 : vector<8x128xf32>
    %310 = vector.broadcast %44 : f32 to vector<8x128xf32>
    %311 = arith.select %309, %310, %307 : vector<8x128xi1>, vector<8x128xf32>
    %312 = vector.broadcast %108 : f32 to vector<8x128xf32>
    %313 = arith.cmpf ogt, %134, %312 : vector<8x128xf32>
    %314 = vector.broadcast %45 : f32 to vector<8x128xf32>
    %315 = arith.select %313, %314, %311 : vector<8x128xi1>, vector<8x128xf32>
    %316 = vector.broadcast %109 : f32 to vector<8x128xf32>
    %317 = arith.cmpf ogt, %134, %316 : vector<8x128xf32>
    %318 = vector.broadcast %46 : f32 to vector<8x128xf32>
    %319 = arith.select %317, %318, %315 : vector<8x128xi1>, vector<8x128xf32>
    %320 = vector.broadcast %110 : f32 to vector<8x128xf32>
    %321 = arith.cmpf ogt, %134, %320 : vector<8x128xf32>
    %322 = vector.broadcast %47 : f32 to vector<8x128xf32>
    %323 = arith.select %321, %322, %319 : vector<8x128xi1>, vector<8x128xf32>
    %324 = vector.broadcast %111 : f32 to vector<8x128xf32>
    %325 = arith.cmpf ogt, %134, %324 : vector<8x128xf32>
    %326 = vector.broadcast %48 : f32 to vector<8x128xf32>
    %327 = arith.select %325, %326, %323 : vector<8x128xi1>, vector<8x128xf32>
    %328 = vector.broadcast %112 : f32 to vector<8x128xf32>
    %329 = arith.cmpf ogt, %134, %328 : vector<8x128xf32>
    %330 = vector.broadcast %49 : f32 to vector<8x128xf32>
    %331 = arith.select %329, %330, %327 : vector<8x128xi1>, vector<8x128xf32>
    %332 = vector.broadcast %113 : f32 to vector<8x128xf32>
    %333 = arith.cmpf ogt, %134, %332 : vector<8x128xf32>
    %334 = vector.broadcast %50 : f32 to vector<8x128xf32>
    %335 = arith.select %333, %334, %331 : vector<8x128xi1>, vector<8x128xf32>
    %336 = vector.broadcast %114 : f32 to vector<8x128xf32>
    %337 = arith.cmpf ogt, %134, %336 : vector<8x128xf32>
    %338 = vector.broadcast %51 : f32 to vector<8x128xf32>
    %339 = arith.select %337, %338, %335 : vector<8x128xi1>, vector<8x128xf32>
    %340 = vector.broadcast %115 : f32 to vector<8x128xf32>
    %341 = arith.cmpf ogt, %134, %340 : vector<8x128xf32>
    %342 = vector.broadcast %52 : f32 to vector<8x128xf32>
    %343 = arith.select %341, %342, %339 : vector<8x128xi1>, vector<8x128xf32>
    %344 = vector.broadcast %116 : f32 to vector<8x128xf32>
    %345 = arith.cmpf ogt, %134, %344 : vector<8x128xf32>
    %346 = vector.broadcast %53 : f32 to vector<8x128xf32>
    %347 = arith.select %345, %346, %343 : vector<8x128xi1>, vector<8x128xf32>
    %348 = vector.broadcast %117 : f32 to vector<8x128xf32>
    %349 = arith.cmpf ogt, %134, %348 : vector<8x128xf32>
    %350 = vector.broadcast %54 : f32 to vector<8x128xf32>
    %351 = arith.select %349, %350, %347 : vector<8x128xi1>, vector<8x128xf32>
    %352 = vector.broadcast %118 : f32 to vector<8x128xf32>
    %353 = arith.cmpf ogt, %134, %352 : vector<8x128xf32>
    %354 = vector.broadcast %55 : f32 to vector<8x128xf32>
    %355 = arith.select %353, %354, %351 : vector<8x128xi1>, vector<8x128xf32>
    %356 = vector.broadcast %119 : f32 to vector<8x128xf32>
    %357 = arith.cmpf ogt, %134, %356 : vector<8x128xf32>
    %358 = vector.broadcast %56 : f32 to vector<8x128xf32>
    %359 = arith.select %357, %358, %355 : vector<8x128xi1>, vector<8x128xf32>
    %360 = vector.broadcast %120 : f32 to vector<8x128xf32>
    %361 = arith.cmpf ogt, %134, %360 : vector<8x128xf32>
    %362 = vector.broadcast %57 : f32 to vector<8x128xf32>
    %363 = arith.select %361, %362, %359 : vector<8x128xi1>, vector<8x128xf32>
    %364 = vector.broadcast %121 : f32 to vector<8x128xf32>
    %365 = arith.cmpf ogt, %134, %364 : vector<8x128xf32>
    %366 = vector.broadcast %58 : f32 to vector<8x128xf32>
    %367 = arith.select %365, %366, %363 : vector<8x128xi1>, vector<8x128xf32>
    %368 = vector.broadcast %122 : f32 to vector<8x128xf32>
    %369 = arith.cmpf ogt, %134, %368 : vector<8x128xf32>
    %370 = vector.broadcast %59 : f32 to vector<8x128xf32>
    %371 = arith.select %369, %370, %367 : vector<8x128xi1>, vector<8x128xf32>
    %372 = vector.broadcast %123 : f32 to vector<8x128xf32>
    %373 = arith.cmpf ogt, %134, %372 : vector<8x128xf32>
    %374 = vector.broadcast %60 : f32 to vector<8x128xf32>
    %375 = arith.select %373, %374, %371 : vector<8x128xi1>, vector<8x128xf32>
    %376 = vector.broadcast %124 : f32 to vector<8x128xf32>
    %377 = arith.cmpf ogt, %134, %376 : vector<8x128xf32>
    %378 = vector.broadcast %61 : f32 to vector<8x128xf32>
    %379 = arith.select %377, %378, %375 : vector<8x128xi1>, vector<8x128xf32>
    %380 = vector.broadcast %125 : f32 to vector<8x128xf32>
    %381 = arith.cmpf ogt, %134, %380 : vector<8x128xf32>
    %382 = vector.broadcast %62 : f32 to vector<8x128xf32>
    %383 = arith.select %381, %382, %379 : vector<8x128xi1>, vector<8x128xf32>
    %384 = vector.broadcast %126 : f32 to vector<8x128xf32>
    %385 = arith.cmpf ogt, %134, %384 : vector<8x128xf32>
    %386 = vector.broadcast %63 : f32 to vector<8x128xf32>
    %387 = arith.select %385, %386, %383 : vector<8x128xi1>, vector<8x128xf32>
    %c0_66 = arith.constant 0 : index
    %c0_67 = arith.constant 0 : index
    %388 = vector.load %arg4[%c0_66, %c0_67] : memref<8x128xf32, #tpu.memory_space<vmem>>, vector<8x128xf32>
    tpu.vector_store %arg4[%c0_66, %c0_67], %387 {strides = array<i32>} : memref<8x128xf32, #tpu.memory_space<vmem>>, vector<8x128xf32>,
    return
  }
  func.func @transform_0(%arg0: i32) -> i32 {
    %c0_i32 = arith.constant 0 : i32
    %c0_i32_0 = arith.constant 0 : i32
    return %c0_i32 : i32
  }
  func.func @transform_1(%arg0: i32) -> i32 {
    %c0_i32 = arith.constant 0 : i32
    %c0_i32_0 = arith.constant 0 : i32
    return %c0_i32 : i32
  }
  func.func @transform_2(%arg0: i32) -> (i32, i32) {
    %c0_i32 = arith.constant 0 : i32
    %c0_i32_0 = arith.constant 0 : i32
    return %arg0, %c0_i32 : i32, i32
  }
  func.func @transform_3(%arg0: i32) -> (i32, i32) {
    %c0_i32 = arith.constant 0 : i32
    %c0_i32_0 = arith.constant 0 : i32
    return %arg0, %c0_i32 : i32, i32
  }
}

</mosaic_0001>

<bundles_post_ra>
// kernel: tpu_custom_call.1
= control target key start
LH: loop header
LB: loop body
LE: loop exit
PB: predicated region body
PF: predicated region fallthrough
CT: control target
= control target key end

     0   :  { %s1998_s0 = inlined_call_operand.hbm [shape: f32[64], index: 0, kind: input, shape index: {}]   ;;  %s1999_s1 = inlined_call_operand.vmem [shape: f32[63], index: 1, kind: input, shape index: {}]   ;;  %s2000_s2 = inlined_call_operand.hbm [shape: f32[16,128], index: 2, kind: input, shape index: {}]   ;;  %s2001_s3 = inlined_call_operand.hbm [shape: f32[16,128], index: 3, kind: output, shape index: {}]  }
   0x1   :  { %2011 = sst [smem:[#allocation19_spill]] %s1998_s0 }
   0x2   :  { %2012 = sst [smem:[#allocation20_spill]] %s1999_s1 }
   0x3   :  { %2013 = sst [smem:[#allocation21_spill]] %s2000_s2 }
   0x4   :  { %8 = vsyncpa [#allocation5], 0 }
   0x5   :  { %9 = vsyncpa [#allocation6], 0 }
   0x6   :  { %10 = vsyncpa [#allocation3], 0 }
   0x7   :  { %12 = vsyncpa [#allocation3 + $0x1], 0 }
   0x8   :  { %13 = vsyncpa [#allocation4], 0 }
   0x9   :  { %15 = vsyncpa [#allocation4 + $0x1], 0  ;;  %s1077_s12 = smov 0   ;;  %s1079_s13 = smov 0  }
   0xa   :  { %s1081_s14 = smov 0   ;;  %s1083_s15 = smov 0  }
   0xb LB: > { %2014 = sst [smem:[#allocation14_spill]] %s1043_s13  ;;  %s1098_s16 = sadd.s32 4294967295, %s1051_s15   ;;  %s1051_s15 = sphi %s1083_s15, %s2130_s15   ;;  %s1047_s14 = sphi %s1081_s14, %s2133_s14   ;;  %s1043_s13 = sphi %s1079_s13, %s2132_s13   ;;  %s1039_s12 = sphi %s1077_s12, %s2131_s12  }
   0xc   : > { %2015 = sst [smem:[#allocation15_spill]] %s1047_s14  ;;  %s707_s17 = sadd.s32 4294967294, %s1051_s15  }
   0xd   : > { %2016 = sst [smem:[#allocation16_spill]] %s1051_s15  ;;  %p83_p0 = scmp.ne.s32.totalorder %s1043_s13, %s1039_s12 }
   0xe   : > { %p2002_p1 = scmp.eq.s32.totalorder %s1098_s16, 0  ;;  %p113_p3 = scmp.eq.s32.totalorder %s707_s17, 1 }
   0xf   : > { %p708_p5 = scmp.ge.s32.totalorder %s1051_s15, 1  ;;  %p120_p7 = scmp.lt.s32.totalorder %s1051_s15, 3 }
  0x10   : > { %p1107_p4 = por %p2002_p1, %p83_p0  ;;  %p1112_p6 = por %p113_p3, %p83_p0 }
  0x11   : > { %p1117_p8 = pnand %p708_p5, %p120_p7  ;;  %s2020_s1 = sld [smem:[#allocation20_spill]] }
  0x12   : > { %s2017_s18 = scalar_select %p1107_p4, 1, 0 }
  0x13   : > { %s2018_s19 = scalar_select %p1112_p6, 1, 0 }
  0x14   : > { %p860_p10 = pneg %p1117_p8  ;;  %s1128_s24 = sadd.s32 1, %s1051_s15  }
  0x15   : > { %2021 = sst [smem:[#allocation17_spill]] %s1128_s24  ;;  %s67_s26 = ssub.s32 %s1051_s15, %s1128_s24 }
  0x16   : > { %p1132_p11 = pnand %p860_p10, %p2002_p1  ;;  %s70_s27 = sadd.s32 1, %s1047_s14 }
  0x17   : > { %s142_s23 = sshll.u32 %s2020_s1, 4  ;;  %p1139_p12 = scmp.eq.s32.totalorder %s67_s26, 0  ;;  %s143_s23 = int_to_ptr.vmem [resolvable:$true] %s142_s23 }
  0x18   : > { %s2024_s0 = sld [smem:[#allocation19_spill]]  ;;  %p921_p0 = pneg %p1132_p11 }
  0x1e   : > { %s919_s4 = scalar_lea.hbm %s2024_s0, 16 }
  0x1f   : > { %p920_p13 = scmp.ne.s32.totalorder %s2024_s0, %s919_s4  ;;  %p926_p7 = scmp.lt.u32.totalorder %s919_s4, %s2024_s0 }
  0x21   : > { %p922_p3 = pnand %p921_p0, %p920_p13 }
  0x23   : > { %p923_p5 = pneg %p922_p3 }
  0x25   : > { %p928_p10 = pnand %p926_p7, %p923_p5 }
  0x27   : > { %931 = shalt.err (!%p928_p10)
}
  0x28   : > { %s1053_s9 = smov [#allocation2]   ;;  %s932_s17 = scalar_lea.vmem %s143_s23, 16 }
  0x29   : > { %863 = dma.hbm_to_smem (!%p1132_p11), %s2024_s0, 16, %s1053_s9, [#allocation5]  }
  0x2a   : > { %p933_p9 = scmp.ne.s32.totalorder %s143_s23, %s932_s17  ;;  %p940_p6 = scmp.lt.s32.totalorder %s143_s23, %s143_s23 }
  0x2b   : > { %p941_p13 = scmp.lt.s32.totalorder %s932_s17, %s932_s17 }
  0x2c   : > { %p935_p1 = pnand %p933_p9, %p921_p0 }
  0x2d   : > { %p942_p3 = por %p941_p13, %p940_p6 }
  0x2e   : > { %p936_p2 = pneg %p935_p1 }
  0x30   : > { %p943_p4 = pnand %p942_p3, %p936_p2 }
  0x32   : > { %946 = shalt.err (!%p943_p4)
}
  0x33   : > { %s1054_s21 = smov [#allocation7]   ;;  %p77_p1 = scmp.ne.s32.totalorder %s1047_s14, %s1043_s13 }
  0x34   : > { %866 = dma.vmem_to_smem (!%p1132_p11), %s143_s23, 16, %s1054_s21, [#allocation6]  }
  0x35   : > { %s1164_s22 = scalar_select %p1139_p12, %s1047_s14, %s70_s27  }
  0x36   : > { %p78_p6 = scmp.eq.s32.totalorder %s1051_s15, 0  ;;  %p877_p2 = scmp.lt.s32.totalorder %s1051_s15, 2 }
  0x37   : > { %2025 = sst [smem:[#allocation18_spill]] %s1164_s22  ;;  %s153_s26 = sand.u32 1, %s1047_s14  }
  0x38   : > { %p79_p4 = por %p78_p6, %p77_p1  ;;  %p2026_p9 = scmp.eq.s32.totalorder %s1098_s16, 1 }
  0x39   : > { %s712_s29 = sshll.u32 %s153_s26, 3  ;;  %s713_s30 = sshll.u32 %s1051_s15, 7 }
  0x3a   : > { %p1173_p0 = por %p2026_p9, %p77_p1  ;;  %s2028_s2 = sld [smem:[#allocation21_spill]] }
  0x3b   : > { %s157_s23 = scalar_lea.vmem [#allocation8], %s712_s29  ;;  %p1185_p11 = pnand %p877_p2, %p79_p4 }
  0x3c   : > { %s2027_s25 = scalar_select %p1173_p0, 1, 0 }
  0x3d   : > { %s164_s27 = sshll.u32 %s157_s23, 4  ;;  %s154_s7 = scalar_lea.sflag [#allocation3], %s153_s26  ;;  %s1183_s27 = int_to_ptr.vmem [resolvable:$true] %s164_s27 }
  0x3e   : > { %p949_p5 = pneg %p1185_p11 }
  0x40   : > { %s1181_s6 = scalar_lea.hbm %s2028_s2, %s713_s30  ;;  %s952_s11 = scalar_lea.hbm %s2028_s2, 256 }
  0x41   : > { %s947_s8 = scalar_lea.hbm %s1181_s6, 128  ;;  %p953_p13 = scmp.lt.u32.totalorder %s1181_s6, %s2028_s2 }
  0x42   : > { %p948_p12 = scmp.ne.s32.totalorder %s1181_s6, %s947_s8  ;;  %p954_p3 = scmp.lt.u32.totalorder %s952_s11, %s947_s8 }
  0x43   : > { %p956_p6 = scmp.lt.u32.totalorder %s947_s8, %s1181_s6 }
  0x44   : > { %p950_p7 = pnand %p949_p5, %p948_p12  ;;  %p955_p1 = por %p954_p3, %p953_p13 }
  0x46   : > { %p951_p10 = pneg %p950_p7  ;;  %p957_p2 = por %p956_p6, %p955_p1 }
  0x48   : > { %p958_p4 = pnand %p957_p2, %p951_p10 }
  0x4a   : > { %961 = shalt.err (!%p958_p4)
}
  0x4b   : > { %s962_s26 = scalar_lea.vmem %s1183_s27, 128  ;;  %s1055_s29 = smov [#allocation8]  }
  0x4c   : > { %p963_p9 = scmp.ne.s32.totalorder %s1183_s27, %s962_s26  ;;  %s967_s30 = sshll.u32 %s1055_s29, 4  ;;  %s968_s30 = int_to_ptr.vmem [resolvable:$false] %s967_s30 }
  0x4d   : > { %s969_s4 = scalar_lea.vmem %s968_s30, 256  ;;  %p970_p0 = scmp.lt.s32.totalorder %s1183_s27, %s968_s30 }
  0x4e   : > { %p965_p12 = pnand %p963_p9, %p949_p5  ;;  %p971_p13 = scmp.lt.s32.totalorder %s969_s4, %s962_s26 }
  0x50   : > { %p966_p7 = pneg %p965_p12  ;;  %p972_p3 = por %p971_p13, %p970_p0 }
  0x52   : > { %p973_p1 = pnand %p972_p3, %p966_p7 }
  0x54   : > { %976 = shalt.err (!%p973_p1)
}
  0x55   : > { %870 = dma.hbm_to_vmem [thread:$0]  (!%p1185_p11), %s1181_s6, 128, %s1183_s27, %s154_s7  }
  0x56   : > { %173 = sbr.rel (%p1117_p8) target bundleno = 212 (0xd4), region = 32  ;;  %p2030_p5 = scmp.eq.s32.totalorder (!%p1117_p8), %s1098_s16, 0 }
  0x5d   : > { %1022 = dma.done.wait (%p2030_p5), [#allocation5], 16   ;;  %p2031_p10 = pmov %p2030_p5 }
  0x5e   : > { %p2032_p6 = pmov %p2030_p5 }
  0x5f   : > { %1024 = vsyncadd (%p2031_p10), [#allocation5], 4294967280 }
  0x60   : > { %1026 = dma.done.wait (%p2032_p6), [#allocation6], 16   ;;  %p2033_p0 = pmov %p2030_p5 }
  0x61   : > { %s1225_s5 = sand.u32 1, %s1043_s13   ;;  %p2034_p8 = scmp.ne.s32.totalorder %s2017_s18, 0 }
  0x62   : > { %1028 = vsyncadd (%p2033_p0), [#allocation6], 4294967280  ;;  %s2005_s20 = sshll.u32 %s1225_s5, 3  ;;  %s184_s6 = scalar_lea.sflag [#allocation3], %s1225_s5 }
  0x63   : > { %s187_s23 = scalar_lea.vmem [#allocation8], %s2005_s20 }
  0x64   : > { %1030 = dma.done.wait (%p2034_p8), %s184_s6, 128  }
  0x65   : > { %1032 = vsyncadd (%p2034_p8), %s184_s6, 4294967168 }
  0x66   : > { %192 = sfence }
  0x67   : > { %v338_v0 = vld [vmem:[%s187_s23] sm:$0xff]  ;;  %s1235_s27 = sld [smem:[#allocation2]]  ;;  %s1237_s28 = sld [smem:[#allocation2 + $0x1]] }
  0x68   : > { %v339_v1 = vsub.f32 0.0, %v338_v0  ;;  %s1239_s7 = sld [smem:[#allocation2 + $0x2]]  ;;  %s1241_s8 = sld [smem:[#allocation2 + $0x3]] }
  0x69   : > { %s1243_s9 = sld [smem:[#allocation2 + $0x4]]  ;;  %s1245_s18 = sld [smem:[#allocation2 + $0x5]] }
  0x6a   : > { %v340_v2 = vmul.f32 1.442695, %v339_v1  ;;  %s1247_s10 = sld [smem:[#allocation2 + $0x6]]  ;;  %s1249_s11 = sld [smem:[#allocation2 + $0x7]] }
  0x6b   : > { %s1251_s17 = sld [smem:[#allocation2 + $0x8]]  ;;  %s1253_s21 = sld [smem:[#allocation2 + $0x9]] }
  0x6c   : > { %915 = vpow2.f32 %v340_v2  ;;  %s1255_s26 = sld [smem:[#allocation2 + $0xa]]  ;;  %s275_s29 = sld [smem:[#allocation7]] }
  0x6d   : > { %s1257_s30 = sld [smem:[#allocation7 + $0x1]]  ;;  %s1259_s4 = sld [smem:[#allocation7 + $0x2]]  ;;  %v345_v7 = vstv %s1235_s27  ;;  %v348_v8 = vstv %s1237_s28 }
  0x6e   : > { %s1261_s6 = sld [smem:[#allocation7 + $0x3]]  ;;  %s1263_s23 = sld [smem:[#allocation7 + $0x4]]  ;;  %v352_v9 = vstv %s1239_s7  ;;  %v356_v10 = vstv %s1241_s8 }
  0x6f   : > { %s1265_s20 = sld [smem:[#allocation7 + $0x5]]  ;;  %s1267_s0 = sld [smem:[#allocation7 + $0x6]]  ;;  %v360_v11 = vstv %s1243_s9  ;;  %v364_v13 = vstv %s1245_s18 }
  0x70   : > { %s1271_s1 = sld [smem:[#allocation7 + $0x7]]  ;;  %s1273_s2 = sld [smem:[#allocation7 + $0x8]]  ;;  %v368_v14 = vstv %s1247_s10  ;;  %v372_v15 = vstv %s1249_s11 }
  0x71   : > { %s1276_s22 = sld [smem:[#allocation7 + $0x9]]  ;;  %s1278_s14 = sld [smem:[#allocation7 + $0xa]]  ;;  %v376_v18 = vstv %s1251_s17  ;;  %v380_v33 = vstv %s1253_s21 }
  0x72   : > { %s1284_s13 = sld [smem:[#allocation7 + $0xb]]  ;;  %s1286_s24 = sld [smem:[#allocation7 + $0xc]]  ;;  %v346_v12 = vstv %s275_s29  ;;  %v384_v41 = vstv %s1255_s26 }
  0x73   : > { %s1291_s27 = sld [smem:[#allocation2 + $0xb]]  ;;  %s1293_s15 = sld [smem:[#allocation7 + $0xd]]  ;;  %v350_v16 = vstv %s1257_s30  ;;  %v354_v17 = vstv %s1259_s4 }
  0x74   : > { %s1299_s28 = sld [smem:[#allocation2 + $0xc]]  ;;  %s1301_s7 = sld [smem:[#allocation7 + $0xe]]  ;;  %v358_v20 = vstv %s1261_s6  ;;  %v362_v22 = vstv %s1263_s23 }
  0x75   : > { %s1306_s8 = sld [smem:[#allocation2 + $0xd]]  ;;  %s1308_s9 = sld [smem:[#allocation7 + $0xf]]  ;;  %v366_v23 = vstv %s1265_s20  ;;  %v370_v26 = vstv %s1267_s0 }
  0x76   : > { %v916_v3 = vpop.eup %915  ;;  %s1313_s18 = sld [smem:[#allocation2 + $0xe]]  ;;  %s1315_s10 = sld [smem:[#allocation7 + $0x10]]  ;;  %v374_v29 = vstv %s1271_s1  ;;  %v378_v30 = vstv %s1273_s2 }
  0x77   : > { %v342_v4 = vadd.f32 1.0, %v916_v3  ;;  %s1324_s11 = sld [smem:[#allocation2 + $0xf]]  ;;  %s1326_s17 = sld [smem:[#allocation7 + $0x11]]  ;;  %v382_v34 = vstv %s1276_s22  ;;  %v386_v37 = vstv %s1278_s14 }
  0x78   : > { %s1335_s20 = sld [smem:[#allocation2 + $0x10]]  ;;  %s1337_s29 = sld [smem:[#allocation7 + $0x12]]  ;;  %v390_v38 = vstv %s1284_s13  ;;  %v394_v42 = vstv %s1286_s24 }
  0x79   : > { %917 = vrcp.f32 %v342_v4  ;;  %s1346_s0 = sld [smem:[#allocation2 + $0x11]]  ;;  %s1348_s30 = sld [smem:[#allocation7 + $0x13]]  ;;  %v388_v45 = vstv %s1291_s27  ;;  %v398_v46 = vstv %s1293_s15 }
  0x7a   : > { %s1359_s1 = sld [smem:[#allocation2 + $0x12]]  ;;  %s1361_s2 = sld [smem:[#allocation7 + $0x14]]  ;;  %v392_v49 = vstv %s1299_s28  ;;  %v402_v50 = vstv %s1301_s7 }
  0x7b   : > { %s1372_s22 = sld [smem:[#allocation2 + $0x13]]  ;;  %s1374_s13 = sld [smem:[#allocation7 + $0x15]]  ;;  %v396_v53 = vstv %s1306_s8  ;;  %v406_v54 = vstv %s1308_s9 }
  0x7c   : > { %s1385_s14 = sld [smem:[#allocation2 + $0x14]]  ;;  %s1387_s24 = sld [smem:[#allocation7 + $0x16]]  ;;  %v400_v57 = vstv %s1313_s18  ;;  %v410_v58 = vstv %s1315_s10 }
  0x7d   : > { %s1398_s21 = sld [smem:[#allocation2 + $0x15]]  ;;  %s1400_s15 = sld [smem:[#allocation7 + $0x17]]  ;;  %v404_v61 = vstv %s1324_s11  ;;  %v414_v62 = vstv %s1326_s17 }
  0x7e   : > { %s1411_s26 = sld [smem:[#allocation2 + $0x16]]  ;;  %s1413_s4 = sld [smem:[#allocation7 + $0x18]]  ;;  %v408_v1 = vstv %s1335_s20  ;;  %v418_v2 = vstv %s1337_s29 }
  0x7f   : > { %s1424_s6 = sld [smem:[#allocation2 + $0x17]]  ;;  %s1426_s23 = sld [smem:[#allocation7 + $0x19]] }
  0x80   : > { %s1437_s27 = sld [smem:[#allocation2 + $0x18]]  ;;  %s1439_s28 = sld [smem:[#allocation7 + $0x1a]] }
  0x81   : > { %s1450_s7 = sld [smem:[#allocation2 + $0x19]]  ;;  %s1452_s8 = sld [smem:[#allocation7 + $0x1b]] }
  0x82   : > { %s1463_s9 = sld [smem:[#allocation2 + $0x1a]]  ;;  %s1465_s18 = sld [smem:[#allocation7 + $0x1c]] }
  0x83   : > { %v918_v5 = vpop.eup %917  ;;  %s1476_s10 = sld [smem:[#allocation2 + $0x1b]]  ;;  %s1478_s11 = sld [smem:[#allocation7 + $0x1d]] }
  0x84   : > { %v1269_v6 = vmul.f32 %v918_v5, %v338_v0  ;;  %v412_v5 = vstv %s1346_s0  ;;  %s1489_s17 = sld [smem:[#allocation2 + $0x1c]]  ;;  %s1491_s20 = sld [smem:[#allocation7 + $0x1e]] }
  0x85   : > { %s1502_s29 = sld [smem:[#allocation2 + $0x1d]]  ;;  %s1504_s0 = sld [smem:[#allocation7 + $0x1f]] }
  0x86   : > { %vm347_vm0 = vcmp.gt.f32.partialorder %v1269_v6, %v346_v12  ;;  %vm351_vm1 = vcmp.gt.f32.partialorder %v1269_v6, %v350_v16  ;;  %vm355_vm2 = vcmp.gt.f32.partialorder %v1269_v6, %v354_v17  ;;  %vm359_vm3 = vcmp.gt.f32.partialorder %v1269_v6, %v358_v20  ;;  %p2126_p2 = scmp.ne.s32.totalorder %s2027_s25, 0 }
  0x87   : > { %v349_v19 = vsel %vm347_vm0, %v348_v8, %v345_v7  ;;  %vm363_vm4 = vcmp.gt.f32.partialorder %v1269_v6, %v362_v22  ;;  %vm1319_vm5 = vcmp.gt.f32.partialorder %v1269_v6, %v366_v23  ;;  %vm1329_vm6 = vcmp.gt.f32.partialorder %v1269_v6, %v370_v26 }
  0x88   : > { %v353_v21 = vsel %vm351_vm1, %v352_v9, %v349_v19  ;;  %vm1340_vm7 = vcmp.gt.f32.partialorder %v1269_v6, %v374_v29  ;;  %vm1353_vm8 = vcmp.gt.f32.partialorder %v1269_v6, %v378_v30  ;;  %vm1366_vm9 = vcmp.gt.f32.partialorder %v1269_v6, %v382_v34 }
  0x89   : > { %v357_v24 = vsel %vm355_vm2, %v356_v10, %v353_v21  ;;  %vm1379_vm10 = vcmp.gt.f32.partialorder %v1269_v6, %v386_v37  ;;  %vm1392_vm11 = vcmp.gt.f32.partialorder %v1269_v6, %v390_v38  ;;  %vm1405_vm12 = vcmp.gt.f32.partialorder %v1269_v6, %v394_v42 }
  0x8a   : > { %v361_v27 = vsel %vm359_vm3, %v360_v11, %v357_v24  ;;  %vm1418_vm13 = vcmp.gt.f32.partialorder %v1269_v6, %v398_v46  ;;  %vm1431_vm14 = vcmp.gt.f32.partialorder %v1269_v6, %v402_v50  ;;  %vm1444_vm15 = vcmp.gt.f32.partialorder %v1269_v6, %v406_v54 }
  0x8b   : > { %v365_v31 = vsel %vm363_vm4, %v364_v13, %v361_v27  ;;  %vm1457_vm0 = vcmp.gt.f32.partialorder %v1269_v6, %v410_v58  ;;  %v422_v7 = vstv %s1348_s30  ;;  %vm1470_vm1 = vcmp.gt.f32.partialorder %v1269_v6, %v414_v62  ;;  %s1515_s30 = sld [smem:[#allocation2 + $0x1e]] }
  0x8c   : > { %v369_v35 = vsel %vm1319_vm5, %v368_v14, %v365_v31  ;;  %v416_v10 = vstv %s1359_s1  ;;  %v426_v11 = vstv %s1361_s2  ;;  %vm1483_vm2 = vcmp.gt.f32.partialorder %v1269_v6, %v418_v2  ;;  %s1517_s1 = sld [smem:[#allocation7 + $0x20]]  ;;  %s1528_s2 = sld [smem:[#allocation2 + $0x1f]] }
  0x8d   : > { %v373_v39 = vsel %vm1329_vm6, %v372_v15, %v369_v35  ;;  %v420_v14 = vstv %s1372_s22  ;;  %v430_v15 = vstv %s1374_s13  ;;  %vm1496_vm3 = vcmp.gt.f32.partialorder %v1269_v6, %v422_v7  ;;  %s1530_s22 = sld [smem:[#allocation7 + $0x21]]  ;;  %s1541_s13 = sld [smem:[#allocation2 + $0x20]] }
  0x8e   : > { %v377_v43 = vsel %vm1340_vm7, %v376_v18, %v373_v39  ;;  %v424_v18 = vstv %s1385_s14  ;;  %v434_v19 = vstv %s1387_s24  ;;  %vm1509_vm4 = vcmp.gt.f32.partialorder %v1269_v6, %v426_v11  ;;  %s1543_s14 = sld [smem:[#allocation7 + $0x22]]  ;;  %s1554_s24 = sld [smem:[#allocation2 + $0x21]] }
  0x8f   : > { %v381_v47 = vsel %vm1353_vm8, %v380_v33, %v377_v43  ;;  %v428_v22 = vstv %s1398_s21  ;;  %v438_v23 = vstv %s1400_s15  ;;  %vm1522_vm5 = vcmp.gt.f32.partialorder %v1269_v6, %v430_v15  ;;  %s1556_s21 = sld [smem:[#allocation7 + $0x23]]  ;;  %s1567_s15 = sld [smem:[#allocation2 + $0x22]] }
  0x90   : > { %v385_v51 = vsel %vm1366_vm9, %v384_v41, %v381_v47  ;;  %v432_v26 = vstv %s1411_s26  ;;  %v442_v27 = vstv %s1413_s4  ;;  %vm1535_vm6 = vcmp.gt.f32.partialorder %v1269_v6, %v434_v19  ;;  %s1569_s26 = sld [smem:[#allocation7 + $0x24]]  ;;  %s1580_s4 = sld [smem:[#allocation2 + $0x23]] }
  0x91   : > { %v389_v55 = vsel %vm1379_vm10, %v388_v45, %v385_v51  ;;  %v436_v30 = vstv %s1424_s6  ;;  %v446_v31 = vstv %s1426_s23  ;;  %vm1548_vm7 = vcmp.gt.f32.partialorder %v1269_v6, %v438_v23  ;;  %s1582_s6 = sld [smem:[#allocation7 + $0x25]]  ;;  %s1593_s23 = sld [smem:[#allocation2 + $0x24]] }
  0x92   : > { %v393_v59 = vsel %vm1392_vm11, %v392_v49, %v389_v55  ;;  %v440_v34 = vstv %s1437_s27  ;;  %v450_v35 = vstv %s1439_s28  ;;  %vm1561_vm8 = vcmp.gt.f32.partialorder %v1269_v6, %v442_v27  ;;  %s1595_s27 = sld [smem:[#allocation7 + $0x26]]  ;;  %s1606_s28 = sld [smem:[#allocation2 + $0x25]] }
  0x93   : > { %v397_v63 = vsel %vm1405_vm12, %v396_v53, %v393_v59  ;;  %v444_v38 = vstv %s1450_s7  ;;  %v454_v39 = vstv %s1452_s8  ;;  %vm1574_vm9 = vcmp.gt.f32.partialorder %v1269_v6, %v446_v31  ;;  %s1608_s7 = sld [smem:[#allocation7 + $0x27]]  ;;  %s1619_s8 = sld [smem:[#allocation2 + $0x26]] }
  0x94   : > { %v401_v3 = vsel %vm1418_vm13, %v400_v57, %v397_v63  ;;  %v448_v42 = vstv %s1463_s9  ;;  %v458_v43 = vstv %s1465_s18  ;;  %vm1587_vm10 = vcmp.gt.f32.partialorder %v1269_v6, %v450_v35  ;;  %s1621_s9 = sld [smem:[#allocation7 + $0x28]]  ;;  %s1632_s18 = sld [smem:[#allocation2 + $0x27]] }
  0x95   : > { %v405_v8 = vsel %vm1431_vm14, %v404_v61, %v401_v3  ;;  %v452_v46 = vstv %s1476_s10  ;;  %v462_v47 = vstv %s1478_s11  ;;  %vm1600_vm11 = vcmp.gt.f32.partialorder %v1269_v6, %v454_v39  ;;  %s1634_s10 = sld [smem:[#allocation7 + $0x29]]  ;;  %s1645_s11 = sld [smem:[#allocation2 + $0x28]] }
  0x96   : > { %v409_v12 = vsel %vm1444_vm15, %v408_v1, %v405_v8  ;;  %v456_v50 = vstv %s1489_s17  ;;  %v466_v51 = vstv %s1491_s20  ;;  %vm1613_vm12 = vcmp.gt.f32.partialorder %v1269_v6, %v458_v43  ;;  %s1647_s17 = sld [smem:[#allocation7 + $0x2a]]  ;;  %s1658_s20 = sld [smem:[#allocation2 + $0x29]] }
  0x97   : > { %v413_v16 = vsel %vm1457_vm0, %v412_v5, %v409_v12  ;;  %v460_v54 = vstv %s1502_s29  ;;  %v470_v55 = vstv %s1504_s0  ;;  %vm1626_vm13 = vcmp.gt.f32.partialorder %v1269_v6, %v462_v47  ;;  %s1660_s29 = sld [smem:[#allocation7 + $0x2b]]  ;;  %s1671_s0 = sld [smem:[#allocation2 + $0x2a]] }
  0x98   : > { %v417_v20 = vsel %vm1470_vm1, %v416_v10, %v413_v16  ;;  %v464_v58 = vstv %s1515_s30  ;;  %v474_v59 = vstv %s1517_s1  ;;  %vm1639_vm14 = vcmp.gt.f32.partialorder %v1269_v6, %v466_v51  ;;  %s1673_s30 = sld [smem:[#allocation7 + $0x2c]]  ;;  %s1684_s1 = sld [smem:[#allocation2 + $0x2b]] }
  0x99   : > { %v421_v24 = vsel %vm1483_vm2, %v420_v14, %v417_v20  ;;  %v468_v62 = vstv %s1528_s2  ;;  %v478_v63 = vstv %s1530_s22  ;;  %vm1652_vm15 = vcmp.gt.f32.partialorder %v1269_v6, %v470_v55  ;;  %s1686_s2 = sld [smem:[#allocation7 + $0x2d]]  ;;  %s1697_s22 = sld [smem:[#allocation2 + $0x2c]] }
  0x9a   : > { %v425_v28 = vsel %vm1496_vm3, %v424_v18, %v421_v24  ;;  %v472_v2 = vstv %s1541_s13  ;;  %v482_v3 = vstv %s1543_s14  ;;  %vm1665_vm0 = vcmp.gt.f32.partialorder %v1269_v6, %v474_v59  ;;  %s1699_s13 = sld [smem:[#allocation7 + $0x2e]]  ;;  %s1710_s14 = sld [smem:[#allocation2 + $0x2d]] }
  0x9b   : > { %v429_v32 = vsel %vm1509_vm4, %v428_v22, %v425_v28  ;;  %v476_v7 = vstv %s1554_s24  ;;  %v486_v8 = vstv %s1556_s21  ;;  %vm1678_vm1 = vcmp.gt.f32.partialorder %v1269_v6, %v478_v63  ;;  %s1712_s24 = sld [smem:[#allocation7 + $0x2f]]  ;;  %s1723_s21 = sld [smem:[#allocation2 + $0x2e]] }
  0x9c   : > { %v433_v36 = vsel %vm1522_vm5, %v432_v26, %v429_v32  ;;  %v480_v11 = vstv %s1567_s15  ;;  %v490_v12 = vstv %s1569_s26  ;;  %vm1691_vm2 = vcmp.gt.f32.partialorder %v1269_v6, %v482_v3  ;;  %s1725_s15 = sld [smem:[#allocation7 + $0x30]]  ;;  %s1736_s26 = sld [smem:[#allocation2 + $0x2f]] }
  0x9d   : > { %v437_v40 = vsel %vm1535_vm6, %v436_v30, %v433_v36  ;;  %v484_v15 = vstv %s1580_s4  ;;  %v494_v16 = vstv %s1582_s6  ;;  %vm1704_vm3 = vcmp.gt.f32.partialorder %v1269_v6, %v486_v8  ;;  %s1738_s4 = sld [smem:[#allocation7 + $0x31]]  ;;  %s1749_s6 = sld [smem:[#allocation2 + $0x30]] }
  0x9e   : > { %v441_v44 = vsel %vm1548_vm7, %v440_v34, %v437_v40  ;;  %v488_v19 = vstv %s1593_s23  ;;  %v498_v20 = vstv %s1595_s27  ;;  %vm1717_vm4 = vcmp.gt.f32.partialorder %v1269_v6, %v490_v12  ;;  %s1751_s23 = sld [smem:[#allocation7 + $0x32]]  ;;  %s1762_s27 = sld [smem:[#allocation2 + $0x31]] }
  0x9f   : > { %v445_v48 = vsel %vm1561_vm8, %v444_v38, %v441_v44  ;;  %v492_v23 = vstv %s1606_s28  ;;  %v502_v24 = vstv %s1608_s7  ;;  %vm1730_vm5 = vcmp.gt.f32.partialorder %v1269_v6, %v494_v16  ;;  %s1764_s28 = sld [smem:[#allocation7 + $0x33]]  ;;  %s1775_s7 = sld [smem:[#allocation2 + $0x32]] }
  0xa0   : > { %v449_v52 = vsel %vm1574_vm9, %v448_v42, %v445_v48  ;;  %v496_v27 = vstv %s1619_s8  ;;  %v506_v28 = vstv %s1621_s9  ;;  %vm1743_vm6 = vcmp.gt.f32.partialorder %v1269_v6, %v498_v20  ;;  %s1777_s8 = sld [smem:[#allocation7 + $0x34]]  ;;  %s1788_s9 = sld [smem:[#allocation2 + $0x33]] }
  0xa1   : > { %v453_v56 = vsel %vm1587_vm10, %v452_v46, %v449_v52  ;;  %v500_v31 = vstv %s1632_s18  ;;  %v510_v32 = vstv %s1634_s10  ;;  %vm1756_vm7 = vcmp.gt.f32.partialorder %v1269_v6, %v502_v24  ;;  %s1790_s18 = sld [smem:[#allocation7 + $0x35]]  ;;  %s1801_s10 = sld [smem:[#allocation2 + $0x34]] }
  0xa2   : > { %v457_v60 = vsel %vm1600_vm11, %v456_v50, %v453_v56  ;;  %v504_v35 = vstv %s1645_s11  ;;  %v514_v36 = vstv %s1647_s17  ;;  %vm1769_vm8 = vcmp.gt.f32.partialorder %v1269_v6, %v506_v28  ;;  %s1803_s11 = sld [smem:[#allocation7 + $0x36]]  ;;  %s1814_s17 = sld [smem:[#allocation2 + $0x35]] }
  0xa3   : > { %v461_v0 = vsel %vm1613_vm12, %v460_v54, %v457_v60  ;;  %v508_v39 = vstv %s1658_s20  ;;  %v518_v40 = vstv %s1660_s29  ;;  %vm1782_vm9 = vcmp.gt.f32.partialorder %v1269_v6, %v510_v32  ;;  %s1816_s20 = sld [smem:[#allocation7 + $0x37]]  ;;  %s1827_s29 = sld [smem:[#allocation2 + $0x36]] }
  0xa4   : > { %v465_v4 = vsel %vm1626_vm13, %v464_v58, %v461_v0  ;;  %v512_v43 = vstv %s1671_s0  ;;  %v522_v44 = vstv %s1673_s30  ;;  %vm1795_vm10 = vcmp.gt.f32.partialorder %v1269_v6, %v514_v36  ;;  %s1829_s0 = sld [smem:[#allocation7 + $0x38]]  ;;  %s1840_s30 = sld [smem:[#allocation2 + $0x37]] }
  0xa5   : > { %v469_v9 = vsel %vm1639_vm14, %v468_v62, %v465_v4  ;;  %v516_v47 = vstv %s1684_s1  ;;  %v526_v48 = vstv %s1686_s2  ;;  %vm1808_vm11 = vcmp.gt.f32.partialorder %v1269_v6, %v518_v40  ;;  %s1842_s1 = sld [smem:[#allocation7 + $0x39]]  ;;  %s1853_s2 = sld [smem:[#allocation2 + $0x38]] }
  0xa6   : > { %v473_v13 = vsel %vm1652_vm15, %v472_v2, %v469_v9  ;;  %v520_v51 = vstv %s1697_s22  ;;  %v530_v52 = vstv %s1699_s13  ;;  %vm1821_vm12 = vcmp.gt.f32.partialorder %v1269_v6, %v522_v44  ;;  %s1855_s22 = sld [smem:[#allocation7 + $0x3a]]  ;;  %s1866_s13 = sld [smem:[#allocation2 + $0x39]] }
  0xa7   : > { %v477_v17 = vsel %vm1665_vm0, %v476_v7, %v473_v13  ;;  %v524_v55 = vstv %s1710_s14  ;;  %v534_v56 = vstv %s1712_s24  ;;  %vm1834_vm13 = vcmp.gt.f32.partialorder %v1269_v6, %v526_v48  ;;  %s1868_s14 = sld [smem:[#allocation7 + $0x3b]]  ;;  %s1879_s24 = sld [smem:[#allocation2 + $0x3a]] }
  0xa8   : > { %v481_v21 = vsel %vm1678_vm1, %v480_v11, %v477_v17  ;;  %v528_v59 = vstv %s1723_s21  ;;  %v538_v60 = vstv %s1725_s15  ;;  %vm1847_vm14 = vcmp.gt.f32.partialorder %v1269_v6, %v530_v52  ;;  %s1881_s21 = sld [smem:[#allocation7 + $0x3c]]  ;;  %s1892_s15 = sld [smem:[#allocation2 + $0x3b]] }
  0xa9   : > { %v485_v25 = vsel %vm1691_vm2, %v484_v15, %v481_v21  ;;  %v532_v63 = vstv %s1736_s26  ;;  %v542_v0 = vstv %s1738_s4  ;;  %vm1860_vm15 = vcmp.gt.f32.partialorder %v1269_v6, %v534_v56  ;;  %s1894_s26 = sld [smem:[#allocation7 + $0x3d]]  ;;  %s1901_s4 = sld [smem:[#allocation2 + $0x3c]] }
  0xaa   : > { %v489_v29 = vsel %vm1704_vm3, %v488_v19, %v485_v25  ;;  %v536_v3 = vstv %s1749_s6  ;;  %v546_v4 = vstv %s1751_s23  ;;  %vm1873_vm0 = vcmp.gt.f32.partialorder %v1269_v6, %v538_v60  ;;  %s1903_s6 = sld [smem:[#allocation7 + $0x3e]]  ;;  %s1910_s23 = sld [smem:[#allocation2 + $0x3d]] }
  0xab   : > { %v493_v33 = vsel %vm1717_vm4, %v492_v23, %v489_v29  ;;  %v540_v8 = vstv %s1762_s27  ;;  %v550_v9 = vstv %s1764_s28  ;;  %vm1886_vm1 = vcmp.gt.f32.partialorder %v1269_v6, %v542_v0  ;;  %s1917_s27 = sld [smem:[#allocation2 + $0x3e]]  ;;  %s1922_s28 = sld [smem:[#allocation2 + $0x3f]] }
  0xac   : > { %v497_v37 = vsel %vm1730_vm5, %v496_v27, %v493_v33  ;;  %v544_v12 = vstv %s1775_s7  ;;  %v554_v13 = vstv %s1777_s8  ;;  %vm547_vm2 = vcmp.gt.f32.partialorder %v1269_v6, %v546_v4  ;;  %s845_s7 = sshll.u32 %s1098_s16, 7  ;;  %s2125_s8 = sshll.u32 %s1225_s5, 3 }
  0xad   : > { %v501_v41 = vsel %vm1743_vm6, %v500_v31, %v497_v37  ;;  %v548_v15 = vstv %s1788_s9  ;;  %v558_v16 = vstv %s1790_s18  ;;  %vm551_vm3 = vcmp.gt.f32.partialorder %v1269_v6, %v550_v9  ;;  %s210_s9 = scalar_lea.vmem [#allocation9], %s2125_s8  ;;  %s600_s16 = scalar_lea.sflag [#allocation4], %s1225_s5 }
  0xae   : > { %v505_v45 = vsel %vm1756_vm7, %v504_v35, %v501_v41  ;;  %v552_v18 = vstv %s1801_s10  ;;  %v562_v19 = vstv %s1803_s11  ;;  %vm555_vm4 = vcmp.gt.f32.partialorder %v1269_v6, %v554_v13  ;;  %s613_s18 = sshll.u32 %s210_s9, 4  ;;  %s1956_s18 = int_to_ptr.vmem [resolvable:$true] %s613_s18 }
  0xaf   : > { %v509_v49 = vsel %vm1769_vm8, %v508_v39, %v505_v45  ;;  %v556_v21 = vstv %s1814_s17  ;;  %v566_v22 = vstv %s1816_s20  ;;  %vm559_vm5 = vcmp.gt.f32.partialorder %v1269_v6, %v558_v16  ;;  %s1954_s17 = scalar_lea.hbm %s2001_s3, %s845_s7  ;;  %s977_s20 = scalar_lea.vmem %s1956_s18, 128 }
  0xb0   : > { %v513_v53 = vsel %vm1782_vm9, %v512_v43, %v509_v49  ;;  %v560_v24 = vstv %s1827_s29  ;;  %v570_v25 = vstv %s1829_s0  ;;  %vm563_vm6 = vcmp.gt.f32.partialorder %v1269_v6, %v562_v19  ;;  %p978_p11 = scmp.ne.s32.totalorder %s1956_s18, %s977_s20  ;;  %s1056_s29 = smov [#allocation9]  }
  0xb1   : > { %v517_v57 = vsel %vm1795_vm10, %v516_v47, %v513_v53  ;;  %v564_v27 = vstv %s1840_s30  ;;  %v574_v28 = vstv %s1842_s1  ;;  %vm567_vm7 = vcmp.gt.f32.partialorder %v1269_v6, %v566_v22  ;;  %s981_s0 = sshll.u32 %s1056_s29, 4  ;;  %s982_s0 = int_to_ptr.vmem [resolvable:$false] %s981_s0 }
  0xb2   : > { %v521_v61 = vsel %vm1808_vm11, %v520_v51, %v517_v57  ;;  %v568_v30 = vstv %s1853_s2  ;;  %v578_v31 = vstv %s1855_s22  ;;  %vm571_vm8 = vcmp.gt.f32.partialorder %v1269_v6, %v570_v25  ;;  %p979_p4 = pnand %p978_p11, %p2126_p2  ;;  %s983_s30 = scalar_lea.vmem %s982_s0, 256 }
  0xb3   : > { %v525_v1 = vsel %vm1821_vm12, %v524_v55, %v521_v61  ;;  %v572_v33 = vstv %s1866_s13  ;;  %v582_v34 = vstv %s1868_s14  ;;  %vm575_vm9 = vcmp.gt.f32.partialorder %v1269_v6, %v574_v28  ;;  %p984_p12 = scmp.lt.s32.totalorder %s1956_s18, %s982_s0  ;;  %p985_p7 = scmp.lt.s32.totalorder %s983_s30, %s977_s20 }
  0xb4   : > { %v529_v5 = vsel %vm1834_vm13, %v528_v59, %v525_v1  ;;  %v576_v36 = vstv %s1879_s24  ;;  %v586_v37 = vstv %s1881_s21  ;;  %vm579_vm10 = vcmp.gt.f32.partialorder %v1269_v6, %v578_v31  ;;  %p980_p9 = pneg %p979_p4 }
  0xb5   : > { %v533_v10 = vsel %vm1847_vm14, %v532_v63, %v529_v5  ;;  %v580_v39 = vstv %s1892_s15  ;;  %v590_v40 = vstv %s1894_s26  ;;  %vm583_vm11 = vcmp.gt.f32.partialorder %v1269_v6, %v582_v34  ;;  %p986_p13 = por %p985_p7, %p984_p12 }
  0xb6   : > { %v537_v14 = vsel %vm1860_vm15, %v536_v3, %v533_v10  ;;  %v584_v42 = vstv %s1901_s4  ;;  %v594_v43 = vstv %s1903_s6  ;;  %vm587_vm12 = vcmp.gt.f32.partialorder %v1269_v6, %v586_v37 }
  0xb7   : > { %v541_v17 = vsel %vm1873_vm0, %v540_v8, %v537_v14  ;;  %v588_v45 = vstv %s1910_s23  ;;  %vm591_vm13 = vcmp.gt.f32.partialorder %v1269_v6, %v590_v40  ;;  %v592_v47 = vstv %s1917_s27  ;;  %p987_p3 = pnand %p986_p13, %p980_p9 }
  0xb8   : > { %v545_v20 = vsel %vm1886_vm1, %v544_v12, %v541_v17  ;;  %vm595_vm14 = vcmp.gt.f32.partialorder %v1269_v6, %v594_v43  ;;  %v596_v49 = vstv %s1922_s28 }
  0xb9   : > { %v549_v23 = vsel %vm547_vm2, %v548_v15, %v545_v20 }
  0xba   : > { %v553_v26 = vsel %vm551_vm3, %v552_v18, %v549_v23 }
  0xbb   : > { %v557_v29 = vsel %vm555_vm4, %v556_v21, %v553_v26 }
  0xbc   : > { %v561_v32 = vsel %vm559_vm5, %v560_v24, %v557_v29 }
  0xbd   : > { %v565_v35 = vsel %vm563_vm6, %v564_v27, %v561_v32 }
  0xbe   : > { %v569_v38 = vsel %vm567_vm7, %v568_v30, %v565_v35 }
  0xbf   : > { %v573_v41 = vsel %vm571_vm8, %v572_v33, %v569_v38 }
  0xc0   : > { %v577_v44 = vsel %vm575_vm9, %v576_v36, %v573_v41 }
  0xc1   : > { %v581_v46 = vsel %vm579_vm10, %v580_v39, %v577_v44 }
  0xc2   : > { %v585_v48 = vsel %vm583_vm11, %v584_v42, %v581_v46 }
  0xc3   : > { %v589_v50 = vsel %vm587_vm12, %v588_v45, %v585_v48 }
  0xc4   : > { %v593_v51 = vsel %vm591_vm13, %v592_v47, %v589_v50 }
  0xc5   : > { %v597_v52 = vsel %vm595_vm14, %v596_v49, %v593_v51 }
  0xc6   : > { %598 = vst [vmem:[%s210_s9] sm:$0xff] %v597_v52 }
  0xc7   : > { %990 = shalt.err (!%p987_p3)
}
  0xc8   : > { %s991_s5 = scalar_lea.hbm %s1954_s17, 128  ;;  %s995_s22 = scalar_lea.hbm %s2001_s3, 256 }
  0xc9   : > { %p992_p1 = scmp.ne.s32.totalorder %s1954_s17, %s991_s5  ;;  %p996_p6 = scmp.lt.u32.totalorder %s1954_s17, %s2001_s3 }
  0xca   : > { %p997_p0 = scmp.lt.u32.totalorder %s995_s22, %s991_s5  ;;  %p999_p11 = scmp.lt.u32.totalorder %s991_s5, %s1954_s17 }
  0xcb   : > { %p993_p5 = pnand %p992_p1, %p2126_p2 }
  0xcc   : > { %p998_p8 = por %p997_p0, %p996_p6 }
  0xcd   : > { %p994_p10 = pneg %p993_p5 }
  0xce   : > { %p1000_p4 = por %p999_p11, %p998_p8 }
  0xd0   : > { %p1001_p9 = pnand %p1000_p4, %p994_p10 }
  0xd2   : > { %1004 = shalt.err (!%p1001_p9)
}
  0xd3   : > { %858 = dma.vmem_to_hbm [thread:$0]  (%p2126_p2), %s1956_s18, 128, %s1954_s17, %s600_s16  }
  0xd4 PF: > { %s2127_s24 = sld [smem:[#allocation16_spill]]  ;;  %s625_s21 = sand.u32 1, %s1039_s12  }
  0xd5   : > { %p2128_p12 = scmp.ne.s32.totalorder %s2018_s19, 0  ;;  %s626_s15 = scalar_lea.sflag [#allocation4], %s625_s21 }
  0xda   : > { %p2129_p7 = scmp.ge.s32.totalorder %s2127_s24, 2 }
  0xdc   : > { %p872_p13 = pnand %p2129_p7, %p2128_p12 }
  0xde   : > { %1034 = dma.done.wait (!%p872_p13), %s626_s15, 128  }
  0xdf   : > { %1036 = vsyncadd (!%p872_p13), %s626_s15, 4294967168  ;;  %s2130_s15 = sld [smem:[#allocation17_spill]]  ;;  %s2131_s12 = sld [smem:[#allocation14_spill]] }
  0xe0   : > { %s2132_s13 = sld [smem:[#allocation15_spill]]  ;;  %s2133_s14 = sld [smem:[#allocation18_spill]] }
  0xe5   : > { %p18_p3 = scmp.ge.s32.totalorder %s2130_s15, 4  }
  0xe7   :  { %20 = sbr.rel (!%p18_p3) target bundleno = 11 (0xb), region = 87 }
  0xee   :  { %631 = vsyncpa [#allocation3], 1 }
  0xef   :  { %633 = vsyncpa [#allocation3 + $0x1], 1 }
  0xf0   :  { %634 = vsyncpa [#allocation4], 1 }
  0xf1   :  { %636 = vsyncpa [#allocation4 + $0x1], 1 }
  0xf2   :  { %637 = vsyncpa [#allocation5], 1 }
  0xf3   :  { %639 = vsyncpa [#allocation5 + $0x1], 1 }
  0xf4   :  { %640 = vsyncpa [#allocation6], 1 }
  0xf5   :  { %642 = vsyncpa [#allocation6 + $0x1], 1 }

</bundles_post_ra>
